<compile_context>
chip_gen: v7x
topology: tpu7x:2x2x1
jax: 0.10.0
libtpu: 0.0.40
codegen_flags: <defaults>
</compile_context>

<pallas_src>
import jax
import jax.numpy as jnp
from jax.experimental import pallas as pl
from jax.experimental.pallas import tpu as pltpu

LANE = 128
_NEG_BIG = -1e30  # effectively -inf for padded class columns (finite: no NaN risk)


def _round_up(v, m):
    return (v + m - 1) // m * m


def _pick_tile(n, cap=512):
    """Largest tile in {cap, 256, 128} that divides n (n is a multiple of 128)."""
    for t in (cap, 256, 128):
        if n % t == 0:
            return t
    return 128


# ---------------------------------------------------------------------------
# Kernel 1: z = (x * xw) @ W        (projection to classes BEFORE propagation)
# ---------------------------------------------------------------------------
def proj_kernel(x_ref, xw_ref, w_ref, o_ref, acc_ref):
    k = pl.program_id(1)

    @pl.when(k == 0)
    def _():
        acc_ref[...] = jnp.zeros_like(acc_ref)

    xm = x_ref[...] * xw_ref[...]  # f32 VPU work (v5e has no bf16 VALU)
    acc_ref[...] += jnp.dot(xm, w_ref[...], preferred_element_type=jnp.float32)

    @pl.when(k == pl.num_programs(1) - 1)
    def _():
        o_ref[...] = acc_ref[...].astype(o_ref.dtype)


# ---------------------------------------------------------------------------
# Kernel 2: h = A @ v               (one propagation step, bf16 MXU, f32 acc)
# ---------------------------------------------------------------------------
def prop_kernel(a_ref, v_ref, o_ref, acc_ref):
    k = pl.program_id(1)

    @pl.when(k == 0)
    def _():
        acc_ref[...] = jnp.zeros_like(acc_ref)

    acc_ref[...] += jnp.dot(a_ref[...], v_ref[...],
                            preferred_element_type=jnp.float32)

    @pl.when(k == pl.num_programs(1) - 1)
    def _():
        o_ref[...] = acc_ref[...].astype(o_ref.dtype)


# ---------------------------------------------------------------------------
# Kernel 3: out = log_softmax(A @ v + b)   (final propagation + fused epilogue)
# ---------------------------------------------------------------------------
def prop_softmax_kernel(a_ref, v_ref, b_ref, o_ref, acc_ref):
    k = pl.program_id(1)

    @pl.when(k == 0)
    def _():
        acc_ref[...] = jnp.zeros_like(acc_ref)

    acc_ref[...] += jnp.dot(a_ref[...], v_ref[...],
                            preferred_element_type=jnp.float32)

    @pl.when(k == pl.num_programs(1) - 1)
    def _():
        # padded class columns carry bias = -1e30 -> exp underflows to 0.
        logits = acc_ref[...] + b_ref[...]
        m = jnp.max(logits, axis=1, keepdims=True)
        s = logits - m
        lse = jnp.log(jnp.sum(jnp.exp(s), axis=1, keepdims=True))
        o_ref[...] = s - lse


# ---------------------------------------------------------------------------
# pallas_call wrappers
# ---------------------------------------------------------------------------
def _project(x_pad, xw_pad, w_pad):
    Np, Fp = x_pad.shape
    Cp = w_pad.shape[1]
    tm, tf = _pick_tile(Np), _pick_tile(Fp)
    return pl.pallas_call(
        proj_kernel,
        out_shape=jax.ShapeDtypeStruct((Np, Cp), jnp.bfloat16),
        grid_spec=pltpu.PrefetchScalarGridSpec(
            num_scalar_prefetch=0,
            grid=(Np // tm, Fp // tf),
            in_specs=[pl.BlockSpec((tm, tf), lambda i, k: (i, k)),
                      pl.BlockSpec((1, tf), lambda i, k: (0, k)),
                      pl.BlockSpec((tf, Cp), lambda i, k: (k, 0))],
            out_specs=pl.BlockSpec((tm, Cp), lambda i, k: (i, 0)),
            scratch_shapes=[pltpu.VMEM((tm, Cp), jnp.float32)]),
        compiler_params=pltpu.CompilerParams(
            dimension_semantics=("parallel", "arbitrary")),
        cost_estimate=pl.CostEstimate(
            flops=2 * Np * Fp * Cp,
            transcendentals=0,
            bytes_accessed=Np * Fp * 4 + Fp * Cp * 4 + Np * Cp * 2),
    )(x_pad, xw_pad, w_pad)


def _propagate(a_pad, v_pad):
    Np = a_pad.shape[0]
    Cp = v_pad.shape[1]
    tm = tk = _pick_tile(Np)
    return pl.pallas_call(
        prop_kernel,
        out_shape=jax.ShapeDtypeStruct((Np, Cp), jnp.bfloat16),
        grid_spec=pltpu.PrefetchScalarGridSpec(
            num_scalar_prefetch=0,
            grid=(Np // tm, Np // tk),
            in_specs=[pl.BlockSpec((tm, tk), lambda i, k: (i, k)),
                      pl.BlockSpec((tk, Cp), lambda i, k: (k, 0))],
            out_specs=pl.BlockSpec((tm, Cp), lambda i, k: (i, 0)),
            scratch_shapes=[pltpu.VMEM((tm, Cp), jnp.float32)]),
        compiler_params=pltpu.CompilerParams(
            dimension_semantics=("parallel", "arbitrary")),
        cost_estimate=pl.CostEstimate(
            flops=2 * Np * Np * Cp,
            transcendentals=0,
            bytes_accessed=Np * Np * 2 + Np * Cp * 2 + Np * Cp * 2),
    )(a_pad, v_pad)


def _propagate_logsoftmax(a_pad, v_pad, b_pad):
    Np = a_pad.shape[0]
    Cp = v_pad.shape[1]
    tm = tk = _pick_tile(Np)
    return pl.pallas_call(
        prop_softmax_kernel,
        out_shape=jax.ShapeDtypeStruct((Np, Cp), jnp.float32),
        grid_spec=pltpu.PrefetchScalarGridSpec(
            num_scalar_prefetch=0,
            grid=(Np // tm, Np // tk),
            in_specs=[pl.BlockSpec((tm, tk), lambda i, k: (i, k)),
                      pl.BlockSpec((tk, Cp), lambda i, k: (k, 0)),
                      pl.BlockSpec((1, Cp), lambda i, k: (0, 0))],
            out_specs=pl.BlockSpec((tm, Cp), lambda i, k: (i, 0)),
            scratch_shapes=[pltpu.VMEM((tm, Cp), jnp.float32)]),
        compiler_params=pltpu.CompilerParams(
            dimension_semantics=("parallel", "arbitrary")),
        cost_estimate=pl.CostEstimate(
            flops=2 * Np * Np * Cp,
            transcendentals=2 * Np * Cp,
            bytes_accessed=Np * Np * 2 + Np * Cp * 2 + Np * Cp * 4),
    )(a_pad, v_pad, b_pad)


# ---------------------------------------------------------------------------
# Plain-JAX glue: replicate SGCNet.forward semantics around the kernels.
# ---------------------------------------------------------------------------
def build_norm_adj(edge_index, edge_weight, num_nodes):
    """PyG gcn_norm with add_self_loops=True, materialized dense [N, N].

    A_norm[dst, src] = deg^{-1/2}[src] * w * deg^{-1/2}[dst], deg = scatter-add
    of edge weights at the target index (unit self loop included).
    """
    row, col = edge_index[0], edge_index[1]
    loop = jnp.arange(num_nodes, dtype=row.dtype)
    row = jnp.concatenate([row, loop])
    col = jnp.concatenate([col, loop])
    ew = jnp.concatenate([edge_weight, jnp.ones((num_nodes,), jnp.float32)])
    deg = jnp.zeros((num_nodes,), jnp.float32).at[col].add(ew)
    dinv = jnp.where(deg > 0, 1.0 / jnp.sqrt(deg), 0.0)
    norm = dinv[row] * ew * dinv[col]
    a = jnp.zeros((num_nodes, num_nodes), jnp.float32).at[col, row].add(norm)
    return a


def sgcnet_forward(x, edge_index, edge_weight_train, x_weight, lin_w, lin_b):
    N, F = x.shape
    C = lin_w.shape[0]

    # adj_sparse path: dropping an edge (|w| == 0) == giving it weight 0 in the
    # normalized adjacency (contributes 0 to deg and to A).
    edge_mask = (jnp.abs(edge_weight_train) > 0).astype(jnp.float32)
    edge_w = jax.nn.sigmoid(edge_weight_train) * edge_mask
    a_norm = build_norm_adj(edge_index, edge_w, N)

    # feature_sparse path: effective per-feature multiplier.
    x_mask = (jnp.abs(x_weight) > 0).astype(jnp.float32)
    xw_eff = jax.nn.sigmoid(x_weight) * x_mask

    # Pad to lane-dense 128-multiples; zero padding is exact for the matmuls,
    # padded class columns get bias = -1e30 so log_softmax ignores them.
    Np = _round_up(N, LANE)
    Fp = _round_up(F, LANE)
    Cp = _round_up(C, LANE)

    a_pad = jnp.zeros((Np, Np), jnp.bfloat16).at[:N, :N].set(
        a_norm.astype(jnp.bfloat16))
    x_pad = jnp.zeros((Np, Fp), jnp.float32).at[:N, :F].set(x)
    xw_pad = jnp.zeros((1, Fp), jnp.float32).at[0, :F].set(xw_eff)
    w_pad = jnp.zeros((Fp, Cp), jnp.float32).at[:F, :C].set(lin_w.T)
    b_pad = jnp.full((1, Cp), _NEG_BIG, jnp.float32).at[0, :C].set(lin_b)

    z = _project(x_pad, xw_pad, w_pad)             # [Np, Cp] bf16
    h = _propagate(a_pad, z)                       # [Np, Cp] bf16
    out = _propagate_logsoftmax(a_pad, h, b_pad)   # [Np, Cp] f32
    return out[:N, :C]


# ---------------------------------------------------------------------------
# Pure-JAX f32 reference (no Pallas) for a sanity check.
# ---------------------------------------------------------------------------
def sgcnet_ref(x, edge_index, edge_weight_train, x_weight, lin_w, lin_b):
    N, F = x.shape
    edge_mask = (jnp.abs(edge_weight_train) > 0).astype(jnp.float32)
    edge_w = jax.nn.sigmoid(edge_weight_train) * edge_mask
    a_norm = build_norm_adj(edge_index, edge_w, N)
    x_mask = (jnp.abs(x_weight) > 0).astype(jnp.float32)
    xw_eff = jax.nn.sigmoid(x_weight) * x_mask
    h = x * xw_eff[None, :]
    h = a_norm @ h
    h = a_norm @ h
    logits = h @ lin_w.T + lin_b[None, :]
    return jax.nn.log_softmax(logits, axis=1)


if __name__ == "__main__":
    # Small synthetic graph consistent with the module's shapes.
    N, F, C, E = 16, 8, 4, 32  # nodes, num_features, num_classes, edges

    key = jax.random.PRNGKey(0)
    k_x, k_src, k_dst, k_ew, k_w, k_b = jax.random.split(key, 6)

    x = jax.random.normal(k_x, (N, F), dtype=jnp.float32)
    src = jax.random.randint(k_src, (E,), 0, N, dtype=jnp.int32)
    dst = jax.random.randint(k_dst, (E,), 0, N, dtype=jnp.int32)
    edge_index = jnp.stack([src, dst], axis=0)                            # [2, E]

    # Parameters (deterministic synthetic init mirroring __init__ shapes):
    edge_weight_train = jax.random.normal(k_ew, (E,), dtype=jnp.float32)  # randn_like(edge_index[0])
    x_weight = jnp.ones((F,), dtype=jnp.float32)                          # ones_like(x)[0]
    lin_w = jax.random.normal(k_w, (C, F), dtype=jnp.float32) * 0.1       # SGConv.lin weight [C, F]
    lin_b = jax.random.normal(k_b, (C,), dtype=jnp.float32) * 0.1         # SGConv.lin bias  [C]

    out = sgcnet_forward(x, edge_index, edge_weight_train, x_weight, lin_w, lin_b)
    out = jax.block_until_ready(out)

    ref = sgcnet_ref(x, edge_index, edge_weight_train, x_weight, lin_w, lin_b)
    assert out.shape == (N, C)
    # bf16 adjacency / propagated activations -> compare with relaxed tolerance.
    assert jnp.allclose(out, ref, atol=2e-2, rtol=2e-2), "mismatch vs reference"
    # rows of log_softmax must exp-sum to 1
    assert jnp.allclose(jnp.sum(jnp.exp(out), axis=1), 1.0, atol=1e-4)

    print("KERNEL_OK")
</pallas_src>

<mosaic_0001>
module attributes {stable_mosaic.version = 11 : i64} {
  func.func @proj_kernel(%arg0: i32, %arg1: i32, %arg2: memref<128x128xf32, #tpu.memory_space<vmem>>, %arg3: memref<1x128xf32, #tpu.memory_space<vmem>>, %arg4: memref<128x128xf32, #tpu.memory_space<vmem>>, %arg5: memref<128x128xbf16, #tpu.memory_space<vmem>>, %arg6: memref<128x128xf32, #tpu.memory_space<vmem>>) attributes {dimension_semantics = [#tpu.dimension_semantics<parallel>, #tpu.dimension_semantics<arbitrary>], iteration_bounds = array<i64: 1, 1>, scalar_prefetch = 0 : i64, scratch_operands = 1 : i64, tpu.core_type = #tpu.core_type<tc>, window_params = [{transform_indices = @transform_0, window_bounds = array<i64: 128, 128>}, {transform_indices = @transform_1, window_bounds = array<i64: 1, 128>}, {transform_indices = @transform_2, window_bounds = array<i64: 128, 128>}, {transform_indices = @transform_3, window_bounds = array<i64: 128, 128>}]} {
    %c0_i32 = arith.constant 0 : i32
    %0 = arith.cmpi eq, %arg1, %c0_i32 : i32
    %1 = arith.extui %0 : i1 to i32
    %c0_i32_0 = arith.constant 0 : i32
    %2 = arith.cmpi ne, %1, %c0_i32_0 : i32
    scf.if %2 {
      %cst_12 = arith.constant 0.000000e+00 : f32
      %15 = vector.broadcast %cst_12 : f32 to vector<128x128xf32>
      %c0_13 = arith.constant 0 : index
      %c0_14 = arith.constant 0 : index
      %16 = vector.load %arg6[%c0_13, %c0_14] : memref<128x128xf32, #tpu.memory_space<vmem>>, vector<128x128xf32>
      tpu.vector_store %arg6[%c0_13, %c0_14], %15 {strides = array<i32>} : memref<128x128xf32, #tpu.memory_space<vmem>>, vector<128x128xf32>,
    } else {
    }
    %c0 = arith.constant 0 : index
    %c0_1 = arith.constant 0 : index
    %3 = vector.load %arg2[%c0, %c0_1] : memref<128x128xf32, #tpu.memory_space<vmem>>, vector<128x128xf32>
    %c0_2 = arith.constant 0 : index
    %c0_3 = arith.constant 0 : index
    %4 = vector.load %arg3[%c0_2, %c0_3] : memref<1x128xf32, #tpu.memory_space<vmem>>, vector<1x128xf32>
    %5 = vector.broadcast %4 : vector<1x128xf32> to vector<128x128xf32>
    %6 = arith.mulf %3, %5 : vector<128x128xf32>
    %c0_4 = arith.constant 0 : index
    %c0_5 = arith.constant 0 : index
    %7 = vector.load %arg6[%c0_4, %c0_5] : memref<128x128xf32, #tpu.memory_space<vmem>>, vector<128x128xf32>
    %c0_6 = arith.constant 0 : index
    %c0_7 = arith.constant 0 : index
    %8 = vector.load %arg4[%c0_6, %c0_7] : memref<128x128xf32, #tpu.memory_space<vmem>>, vector<128x128xf32>
    %cst = arith.constant dense<0.000000e+00> : vector<128x128xf32>
    %9 = tpu.matmul %6, %8, %cst {dimension_numbers = #tpu.dot_dimension_numbers<[1], [0], [0], [1], [0, 0, 1, 1], [], []>} : vector<128x128xf32>, vector<128x128xf32>, vector<128x128xf32> -> vector<128x128xf32>
    %10 = arith.addf %7, %9 : vector<128x128xf32>
    %c0_8 = arith.constant 0 : index
    %c0_9 = arith.constant 0 : index
    %11 = vector.load %arg6[%c0_8, %c0_9] : memref<128x128xf32, #tpu.memory_space<vmem>>, vector<128x128xf32>
    tpu.vector_store %arg6[%c0_8, %c0_9], %10 {strides = array<i32>} : memref<128x128xf32, #tpu.memory_space<vmem>>, vector<128x128xf32>,
    %c0_i32_10 = arith.constant 0 : i32
    %12 = arith.cmpi eq, %arg1, %c0_i32_10 : i32
    %13 = arith.extui %12 : i1 to i32
    %c0_i32_11 = arith.constant 0 : i32
    %14 = arith.cmpi ne, %13, %c0_i32_11 : i32
    scf.if %14 {
      %c0_12 = arith.constant 0 : index
      %c0_13 = arith.constant 0 : index
      %15 = vector.load %arg6[%c0_12, %c0_13] : memref<128x128xf32, #tpu.memory_space<vmem>>, vector<128x128xf32>
      %16 = arith.truncf %15 : vector<128x128xf32> to vector<128x128xbf16>
      %c0_14 = arith.constant 0 : index
      %c0_15 = arith.constant 0 : index
      %17 = vector.load %arg5[%c0_14, %c0_15] : memref<128x128xbf16, #tpu.memory_space<vmem>>, vector<128x128xbf16>
      tpu.vector_store %arg5[%c0_14, %c0_15], %16 {strides = array<i32>} : memref<128x128xbf16, #tpu.memory_space<vmem>>, vector<128x128xbf16>,
    } else {
    }
    return
  }
  func.func @transform_0(%arg0: i32, %arg1: i32) -> (i32, i32) {
    %c0_i32 = arith.constant 0 : i32
    return %arg0, %arg1 : i32, i32
  }
  func.func @transform_1(%arg0: i32, %arg1: i32) -> (i32, i32) {
    %c0_i32 = arith.constant 0 : i32
    %c0_i32_0 = arith.constant 0 : i32
    return %c0_i32, %arg1 : i32, i32
  }
  func.func @transform_2(%arg0: i32, %arg1: i32) -> (i32, i32) {
    %c0_i32 = arith.constant 0 : i32
    %c0_i32_0 = arith.constant 0 : i32
    return %arg1, %c0_i32 : i32, i32
  }
  func.func @transform_3(%arg0: i32, %arg1: i32) -> (i32, i32) {
    %c0_i32 = arith.constant 0 : i32
    %c0_i32_0 = arith.constant 0 : i32
    return %arg0, %c0_i32 : i32, i32
  }
}

</mosaic_0001>

<bundles_post_ra>
// kernel: tpu_custom_call.1
= control target key start
LH: loop header
LB: loop body
LE: loop exit
PB: predicated region body
PF: predicated region fallthrough
CT: control target
= control target key end

     0   :  { %8 = vsyncpa [#allocation4], 0  ;;  %s807_s0 = inlined_call_operand.hbm [shape: f32[128,128], index: 0, kind: input, shape index: {}]   ;;  %s808_s1 = inlined_call_operand.vmem [shape: f32[1,128], index: 1, kind: input, shape index: {}]   ;;  %s809_s2 = inlined_call_operand.hbm [shape: f32[128,128], index: 2, kind: input, shape index: {}]   ;;  %s810_s3 = inlined_call_operand.hbm [shape: bf16[128,128], index: 3, kind: output, shape index: {}]  }
   0x1   :  { %9 = vsyncpa [#allocation7], 0 }
   0x2   :  { %10 = vsyncpa [#allocation5], 0  ;;  %s723_s12 = smov [#allocation3]   ;;  %s651_s16 = scalar_lea.hbm %s807_s0, 2048 }
   0x3   :  { %s16_s13 = sshll.u32 %s723_s12, 4  ;;  %p652_p0 = scmp.ne.s32.totalorder %s807_s0, %s651_s16  ;;  %s17_s13 = int_to_ptr.vmem [resolvable:$true] %s16_s13 }
   0x4   :  { %p655_p1 = scmp.lt.u32.totalorder %s651_s16, %s807_s0 }
   0x6   :  { %p657_p2 = pnand %p655_p1, %p652_p0 }
   0x8   :  { %660 = shalt.err (!%p657_p2)
}
   0x9   :  { %s661_s21 = scalar_lea.vmem %s17_s13, 2048  ;;  %p666_p4 = scmp.lt.s32.totalorder %s17_s13, %s17_s13 }
   0xa   :  { %p662_p3 = scmp.ne.s32.totalorder %s17_s13, %s661_s21  ;;  %p667_p5 = scmp.lt.s32.totalorder %s661_s21, %s661_s21 }
   0xc   :  { %p668_p6 = por %p667_p5, %p666_p4 }
   0xe   :  { %p669_p7 = pnand %p668_p6, %p662_p3 }
  0x10   :  { %672 = shalt.err (!%p669_p7)
}
  0x11   :  { %s724_s22 = smov 128   ;;  %s725_s23 = smov 8  }
  0x12   :  { %22 = dma.hbm_to_vmem [thread:$0]  %s807_s0, 2048, %s17_s13, [#allocation4], %s724_s22, %s724_s22, %s725_s23  }
  0x13   :  { %s726_s26 = smov [#allocation6]   ;;  %s673_s30 = scalar_lea.hbm %s809_s2, 2048 }
  0x14   :  { %s30_s27 = sshll.u32 %s726_s26, 4  ;;  %p674_p8 = scmp.ne.s32.totalorder %s809_s2, %s673_s30  ;;  %s31_s27 = int_to_ptr.vmem [resolvable:$true] %s30_s27 }
  0x15   :  { %p677_p9 = scmp.lt.u32.totalorder %s673_s30, %s809_s2 }
  0x17   :  { %p679_p10 = pnand %p677_p9, %p674_p8 }
  0x19   :  { %682 = shalt.err (!%p679_p10)
}
  0x1a   :  { %s683_s8 = scalar_lea.vmem %s31_s27, 2048  ;;  %p688_p12 = scmp.lt.s32.totalorder %s31_s27, %s31_s27 }
  0x1b   :  { %p684_p11 = scmp.ne.s32.totalorder %s31_s27, %s683_s8  ;;  %p689_p13 = scmp.lt.s32.totalorder %s683_s8, %s683_s8 }
  0x1d   :  { %p690_p0 = por %p689_p13, %p688_p12 }
  0x1f   :  { %p691_p1 = pnand %p690_p0, %p684_p11 }
  0x21   :  { %694 = shalt.err (!%p691_p1)
}
  0x22   :  { %36 = dma.hbm_to_vmem [thread:$0]  %s809_s2, 2048, %s31_s27, [#allocation7], %s724_s22, %s724_s22, %s725_s23  }
  0x23   :  { %717 = dma.done.wait [#allocation4], 2048  }
  0x24   :  { %718 = vsyncadd [#allocation4], 4294965248 }
  0x25   :  { %719 = dma.done.wait [#allocation7], 2048  }
  0x26   :  { %720 = vsyncadd [#allocation7], 4294965248  ;;  %v118_v0 = vld [vmem:[#allocation6] sm:$0xff]  ;;  %v119_v1 = vld [vmem:[#allocation6 + $0x8] sm:$0xff] }
  0x27   :  { %v120_v2 = vld [vmem:[#allocation6 + $0x10] sm:$0xff]  ;;  %v596_v3 = vpack.c.bf16 %v119_v1, %v118_v0  ;;  %v121_v4 = vld [vmem:[#allocation6 + $0x18] sm:$0xff]  ;;  %v122_v6 = vld [vmem:[#allocation6 + $0x20] sm:$0xff] }
  0x28   :  { %v600_v5 = vpack.c.bf16 %v121_v4, %v120_v2  ;;  %v123_v7 = vld [vmem:[#allocation6 + $0x28] sm:$0xff]  ;;  %v63_v9 = vld [vmem:[#allocation3] sm:$0xff]  ;;  %v124_v11 = vld [vmem:[#allocation6 + $0x30] sm:$0xff] }
  0x29   :  { %597 = vmatprep.subr.bf16.mxu0 %v596_v3  ;;  %628 = vmatprep.subr.bf16.mxu1 %v596_v3  ;;  %v604_v8 = vpack.c.bf16 %v123_v7, %v122_v6  ;;  %v777_v10 = vld [vmem:[%s808_s1] ss:$0 sm:$0xff]  ;;  %v125_v12 = vld [vmem:[#allocation6 + $0x38] sm:$0xff]  ;;  %v127_v18 = vld [vmem:[#allocation6 + $0x48] sm:$0xff]  ;;  %s727_s1 = smov [#allocation8]  }
  0x2a   :  { %599 = vmatpush3.bf16.msra.mxu0 %v596_v3  ;;  %636 = vmatpush3.bf16.msra.mxu1 %v596_v3  ;;  %v86_v13 = vmul.f32 %v777_v10, %v63_v9  ;;  %v71_v14 = vld [vmem:[#allocation3 + $0x40] sm:$0xff]  ;;  %v608_v16 = vpack.c.bf16 %v125_v12, %v124_v11  ;;  %v128_v20 = vld [vmem:[#allocation6 + $0x50] sm:$0xff]  ;;  %v129_v21 = vld [vmem:[#allocation6 + $0x58] sm:$0xff]  ;;  %s415_s11 = sshll.u32 %s727_s1, 4  ;;  %s416_s11 = int_to_ptr.vmem [resolvable:$true] %s415_s11 }
  0x2b   :  { %601 = vmatprep.subr.bf16.mxu0 %v600_v5  ;;  %629 = vmatprep.subr.bf16.mxu1 %v600_v5  ;;  %v94_v15 = vmul.f32 %v777_v10, %v71_v14  ;;  %v126_v17 = vld [vmem:[#allocation6 + $0x40] sm:$0xff]  ;;  %v616_v22 = vpack.c.bf16 %v129_v21, %v128_v20  ;;  %v131_v24 = vld [vmem:[#allocation6 + $0x68] sm:$0xff]  ;;  %v132_v26 = vld [vmem:[#allocation6 + $0x70] sm:$0xff]  ;;  %s695_s12 = scalar_lea.vmem %s416_s11, 1024  ;;  %p700_p3 = scmp.lt.s32.totalorder %s416_s11, %s416_s11 }
  0x2c   :  { %572 = vmatprep.mubr.f32.mxu0 %v86_v13  ;;  %v612_v19 = vpack.c.bf16 %v127_v18, %v126_v17  ;;  %v130_v23 = vld [vmem:[#allocation6 + $0x60] sm:$0xff]  ;;  %v133_v27 = vld [vmem:[#allocation6 + $0x78] sm:$0xff]  ;;  %v64_v29 = vld [vmem:[#allocation3 + $0x8] sm:$0xff]  ;;  %p696_p2 = scmp.ne.s32.totalorder %s416_s11, %s695_s12  ;;  %p701_p4 = scmp.lt.s32.totalorder %s695_s12, %s695_s12 }
  0x2d   :  { %584 = vmatprep.mubr.f32.mxu1 %v94_v15  ;;  %v620_v25 = vpack.c.bf16 %v131_v24, %v130_v23  ;;  %v624_v28 = vpack.c.bf16 %v133_v27, %v132_v26  ;;  %v72_v30 = vld [vmem:[#allocation3 + $0x48] sm:$0xff]  ;;  %v65_v31 = vld [vmem:[#allocation3 + $0x10] sm:$0xff]  ;;  %v87_v33 = vmul.f32 %v777_v10, %v64_v29  ;;  %v66_v37 = vld [vmem:[#allocation3 + $0x18] sm:$0xff] }
  0x2e   :  { %603 = vmatpush3.bf16.msra.mxu0 %v600_v5  ;;  %637 = vmatpush3.bf16.msra.mxu1 %v600_v5  ;;  %v73_v32 = vld [vmem:[#allocation3 + $0x50] sm:$0xff]  ;;  %v95_v34 = vmul.f32 %v777_v10, %v72_v30  ;;  %v88_v35 = vmul.f32 %v777_v10, %v65_v31  ;;  %v74_v38 = vld [vmem:[#allocation3 + $0x58] sm:$0xff]  ;;  %v67_v39 = vld [vmem:[#allocation3 + $0x20] sm:$0xff]  ;;  %v89_v41 = vmul.f32 %v777_v10, %v66_v37  ;;  %p702_p5 = por %p701_p4, %p700_p3 }
  0x2f   :  { %605 = vmatprep.subr.bf16.mxu0 %v604_v8  ;;  %630 = vmatprep.subr.bf16.mxu1 %v604_v8  ;;  %v96_v36 = vmul.f32 %v777_v10, %v73_v32  ;;  %v75_v40 = vld [vmem:[#allocation3 + $0x60] sm:$0xff]  ;;  %v97_v42 = vmul.f32 %v777_v10, %v74_v38  ;;  %v90_v43 = vmul.f32 %v777_v10, %v67_v39  ;;  %v68_v45 = vld [vmem:[#allocation3 + $0x28] sm:$0xff]  ;;  %v69_v47 = vld [vmem:[#allocation3 + $0x30] sm:$0xff] }
  0x30   :  { %v98_v44 = vmul.f32 %v777_v10, %v75_v40  ;;  %v76_v46 = vld [vmem:[#allocation3 + $0x68] sm:$0xff]  ;;  %v77_v48 = vld [vmem:[#allocation3 + $0x70] sm:$0xff]  ;;  %v91_v49 = vmul.f32 %v777_v10, %v68_v45  ;;  %v92_v51 = vmul.f32 %v777_v10, %v69_v47  ;;  %v70_v53 = vld [vmem:[#allocation3 + $0x38] sm:$0xff]  ;;  %p703_p6 = pnand %p702_p5, %p696_p2 }
  0x31   :  { %v99_v50 = vmul.f32 %v777_v10, %v76_v46  ;;  %v100_v52 = vmul.f32 %v777_v10, %v77_v48  ;;  %v78_v54 = vld [vmem:[#allocation3 + $0x78] sm:$0xff]  ;;  %v93_v55 = vmul.f32 %v777_v10, %v70_v53 }
  0x32   :  { %607 = vmatpush3.bf16.msra.mxu0 %v604_v8  ;;  %638 = vmatpush3.bf16.msra.mxu1 %v604_v8  ;;  %v101_v56 = vmul.f32 %v777_v10, %v78_v54 }
  0x33   :  { %609 = vmatprep.subr.bf16.mxu0 %v608_v16  ;;  %631 = vmatprep.subr.bf16.mxu1 %v608_v16 }
  0x36   :  { %611 = vmatpush3.bf16.msra.mxu0 %v608_v16  ;;  %639 = vmatpush3.bf16.msra.mxu1 %v608_v16 }
  0x37   :  { %613 = vmatprep.subr.bf16.mxu0 %v612_v19  ;;  %632 = vmatprep.subr.bf16.mxu1 %v612_v19 }
  0x3a   :  { %615 = vmatpush3.bf16.msra.mxu0 %v612_v19  ;;  %640 = vmatpush3.bf16.msra.mxu1 %v612_v19 }
  0x3b   :  { %617 = vmatprep.subr.bf16.mxu0 %v616_v22  ;;  %633 = vmatprep.subr.bf16.mxu1 %v616_v22 }
  0x3e   :  { %619 = vmatpush3.bf16.msra.mxu0 %v616_v22  ;;  %641 = vmatpush3.bf16.msra.mxu1 %v616_v22 }
  0x3f   :  { %621 = vmatprep.subr.bf16.mxu0 %v620_v25  ;;  %634 = vmatprep.subr.bf16.mxu1 %v620_v25 }
  0x42   :  { %623 = vmatpush3.bf16.msra.mxu0 %v620_v25  ;;  %642 = vmatpush3.bf16.msra.mxu1 %v620_v25 }
  0x43   :  { %625 = vmatprep.subr.bf16.mxu0 %v624_v28  ;;  %635 = vmatprep.subr.bf16.mxu1 %v624_v28 }
  0x46   :  { %627 = vmatpush3.bf16.msra.mxu0 %v624_v28  ;;  %643 = vmatpush3.bf16.msra.mxu1 %v624_v28 }
  0x49   :  { %573 = vmatmul.mubr.f32.vlgmr.msra.gmra.mrb[0].mxu0 %v87_v33  ;;  %585 = vmatmul.mubr.f32.vlgmr.msra.gmra.mrb[0].mxu1 %v95_v34 }
  0x4a   :  { %575 = vmatprep.mubr.f32.mxu0 %v88_v35  ;;  %587 = vmatprep.mubr.f32.mxu1 %v96_v36 }
  0x4d   :  { %576 = vmatmul.mubr.f32.gmra.mrb[2].mxu0 %v89_v41  ;;  %588 = vmatmul.mubr.f32.gmra.mrb[2].mxu1 %v97_v42 }
  0x4e   :  { %578 = vmatprep.mubr.f32.mxu0 %v90_v43  ;;  %590 = vmatprep.mubr.f32.mxu1 %v98_v44 }
  0x51   :  { %579 = vmatmul.mubr.f32.gmra.mrb[4].mxu0 %v91_v49  ;;  %591 = vmatmul.mubr.f32.gmra.mrb[4].mxu1 %v99_v50 }
  0x52   :  { %581 = vmatprep.mubr.f32.mxu0 %v92_v51  ;;  %593 = vmatprep.mubr.f32.mxu1 %v100_v52 }
  0x55   :  { %582 = vmatmul.mubr.f32.gmra.mrb[6].mxu0 %v93_v55  ;;  %594 = vmatmul.mubr.f32.gmra.mrb[6].mxu1 %v101_v56 }
 0x11c   :  { %v574_v57 = vpop.f32.mrb[0].mxu0  ;;  %v586_v58 = vpop.f32.mrb[0].mxu1 }
 0x11d   :  { %v200_v59 = vpop.f32.mrb[1].mxu0  ;;  %v240_v60 = vpop.f32.mrb[1].mxu1 }
 0x11e   :  { %v464_v61 = vpack.c.bf16 %v574_v57, %v200_v59  ;;  %v484_v62 = vpack.c.bf16 %v586_v58, %v240_v60 }
 0x120   :  { %465 = vst [vmem:[#allocation8] sm:$0xff] %v464_v61   ;;  %504 = vst [vmem:[#allocation8 + $0x20] sm:$0xff] %v484_v62   ;;  %v577_v63 = vpop.f32.mrb[2].mxu0  ;;  %v589_v0 = vpop.f32.mrb[2].mxu1 }
 0x121   :  { %v210_v1 = vpop.f32.mrb[3].mxu0  ;;  %v250_v2 = vpop.f32.mrb[3].mxu1 }
 0x122   :  { %v469_v3 = vpack.c.bf16 %v577_v63, %v210_v1  ;;  %v489_v4 = vpack.c.bf16 %v589_v0, %v250_v2 }
 0x124   :  { %501 = vst [vmem:[#allocation8 + $0x8] sm:$0xff] %v469_v3   ;;  %505 = vst [vmem:[#allocation8 + $0x28] sm:$0xff] %v489_v4   ;;  %v580_v5 = vpop.f32.mrb[4].mxu0  ;;  %v592_v6 = vpop.f32.mrb[4].mxu1 }
 0x125   :  { %v220_v7 = vpop.f32.mrb[5].mxu0  ;;  %v260_v8 = vpop.f32.mrb[5].mxu1 }
 0x126   :  { %v474_v9 = vpack.c.bf16 %v580_v5, %v220_v7  ;;  %v494_v10 = vpack.c.bf16 %v592_v6, %v260_v8 }
 0x128   :  { %502 = vst [vmem:[#allocation8 + $0x10] sm:$0xff] %v474_v9   ;;  %506 = vst [vmem:[#allocation8 + $0x30] sm:$0xff] %v494_v10   ;;  %v583_v11 = vpop.f32.mrb[6].mxu0  ;;  %v595_v12 = vpop.f32.mrb[6].mxu1 }
 0x129   :  { %v230_v13 = vpop.f32.mrb[7].mxu0  ;;  %v270_v14 = vpop.f32.mrb[7].mxu1 }
 0x12a   :  { %v479_v15 = vpack.c.bf16 %v583_v11, %v230_v13  ;;  %v499_v16 = vpack.c.bf16 %v595_v12, %v270_v14 }
 0x12c   :  { %503 = vst [vmem:[#allocation8 + $0x18] sm:$0xff] %v479_v15   ;;  %507 = vst [vmem:[#allocation8 + $0x38] sm:$0xff] %v499_v16  }
 0x12d   :  { %706 = shalt.err (!%p703_p6)
}
 0x12e   :  { %s707_s15 = scalar_lea.hbm %s810_s3, 1024 }
 0x12f   :  { %p708_p7 = scmp.ne.s32.totalorder %s810_s3, %s707_s15  ;;  %p711_p8 = scmp.lt.u32.totalorder %s707_s15, %s810_s3 }
 0x131   :  { %p713_p9 = pnand %p711_p8, %p708_p7 }
 0x133   :  { %716 = shalt.err (!%p713_p9)
}
 0x134   :  { %s728_s20 = smov 64   ;;  %s729_s21 = smov 4  }
 0x135   :  { %421 = dma.vmem_to_hbm [thread:$0]  %s416_s11, 1024, %s810_s3, [#allocation5], %s728_s20, %s728_s20, %s729_s21  }
 0x136   :  { %721 = dma.done.wait [#allocation5], 1024  }
 0x137   :  { %722 = vsyncadd [#allocation5], 4294966272 }
 0x138   :  { %425 = vsyncpa [#allocation4], 1 }
 0x139   :  { %426 = vsyncpa [#allocation7], 1 }
 0x13a   :  { %427 = vsyncpa [#allocation5], 1 }

</bundles_post_ra>
